<compile_context>
chip_gen: v5e
topology: v5e:2x2
jax: 0.10.0
libtpu: 0.0.40
codegen_flags: <defaults>
</compile_context>

<pallas_src>
import functools

import jax
import jax.numpy as jnp
from jax import lax
from jax.experimental import pallas as pl
from jax.experimental.pallas import tpu as pltpu

LEAK_FACTOR = 0.2
NUM_TOPICS = 20
HIDDEN = 10
OUT = 4
BN_EPS = 1e-5
LANE = 128

# Packed (16, 128) f32 parameter block (one resident DMA per kernel):
#   rows 0..9,   cols 0..19 : w1^T                  [10, 20]
#   rows 0..9,   col  20    : b1                    [10]
#   rows 10..13, cols 0..9  : w2' = w2^T * scale    [4, 10]   (apply pass only)
#   rows 10..13, col  10    : b2' = b2 + w2^T@shift [4]       (apply pass only)
PBLK_ROWS = 16
PBLK_COLS = 128


def _round_up(x, m):
    return (x + m - 1) // m * m


def _first_linear(x_ref, p_ref):
    """leaky_relu(w1^T @ x + b1) in feature-major layout -> [HIDDEN, tile]."""
    x = x_ref[...].astype(jnp.float32)                        # [20, tile]
    w1t = p_ref[0:HIDDEN, 0:NUM_TOPICS]                       # [10, 20]
    b1 = p_ref[0:HIDDEN, NUM_TOPICS:NUM_TOPICS + 1]           # [10, 1]
    h = jnp.dot(w1t, x, preferred_element_type=jnp.float32) + b1
    return jnp.maximum(h, LEAK_FACTOR * h)                    # LeakyReLU(0.2)


def _stats_kernel(x_ref, p_ref, o_ref, *, batch, tile_cols):
    """Per-tile partial BN statistics: sum(h) and sum(h^2) over the batch lanes."""
    h = _first_linear(x_ref, p_ref)                           # [10, tile]

    def emit(hv):
        o_ref[...] = jnp.zeros_like(o_ref)
        o_ref[0:HIDDEN, 0:1] = jnp.sum(hv, axis=1, keepdims=True)
        o_ref[0:HIDDEN, 1:2] = jnp.sum(hv * hv, axis=1, keepdims=True)

    tail = batch % tile_cols
    if tail == 0:
        emit(h)
    else:
        # Only the last tile pays the iota/compare/select for padded lanes.
        is_last = pl.program_id(0) == pl.num_programs(0) - 1

        @pl.when(jnp.logical_not(is_last))
        def _():
            emit(h)

        @pl.when(is_last)
        def _():
            lane = lax.broadcasted_iota(jnp.int32, h.shape, 1)
            emit(jnp.where(lane < tail, h, 0.0))


def _apply_kernel(x_ref, p_ref, o_ref):
    """Recompute h, apply BN-folded Linear(10,4) and softmax; lane-dense store."""
    h = _first_linear(x_ref, p_ref)                           # [10, tile]
    w2p = p_ref[HIDDEN:HIDDEN + OUT, 0:HIDDEN]                # [4, 10]
    b2p = p_ref[HIDDEN:HIDDEN + OUT, HIDDEN:HIDDEN + 1]       # [4, 1]
    logits = jnp.dot(w2p, h, preferred_element_type=jnp.float32) + b2p  # [4, tile]
    m = jnp.max(logits, axis=0, keepdims=True)
    e = jnp.exp(logits - m)
    denom = jnp.sum(e, axis=0, keepdims=True)
    # Exact divide (NOT approx reciprocal) so each row sums to 1 to f32 rounding.
    o_ref[...] = (e / denom).astype(o_ref.dtype)


def pack_base(w1, b1):
    p = jnp.zeros((PBLK_ROWS, PBLK_COLS), jnp.float32)
    p = p.at[0:HIDDEN, 0:NUM_TOPICS].set(jnp.asarray(w1, jnp.float32).T)
    p = p.at[0:HIDDEN, NUM_TOPICS].set(jnp.asarray(b1, jnp.float32).reshape(-1))
    return p


def alpha_generator_forward(noise, w1, b1, gamma, beta, w2, b2, *,
                            block_cols=8192):
    """Forward pass using batch statistics (training-mode BatchNorm)."""
    B = noise.shape[0]
    tb = max(LANE, min(_round_up(block_cols, LANE), _round_up(B, LANE)))
    bp = _round_up(B, tb)
    nbt = bp // tb

    # Feature-major, lane-dense input slab [20, B_pad]. Producers able to emit
    # noise feature-major directly can skip this (cheap) transpose.
    xt = jnp.pad(jnp.asarray(noise, jnp.float32), ((0, bp - B), (0, 0))).T
    # TODO(synk): optionally stream xt as bf16 (upcast in-kernel) for another
    # ~2x on read traffic; kept f32 here for exact parity with the reference.

    p_base = pack_base(w1, b1)

    compiler_params = pltpu.CompilerParams(
        dimension_semantics=("parallel",),        # batch tiles shard across TCs (v7x)
        vmem_limit_bytes=32 * 1024 * 1024,        # v7x-safe (64 MiB physical)
    )
    in_specs = [
        pl.BlockSpec((NUM_TOPICS, tb), lambda i: (0, i)),        # noise tile
        pl.BlockSpec((PBLK_ROWS, PBLK_COLS), lambda i: (0, 0)),  # resident params
    ]

    # ---- Pass 1: per-tile partial BN statistics ------------------------------
    stats = pl.pallas_call(
        functools.partial(_stats_kernel, batch=B, tile_cols=tb),
        out_shape=jax.ShapeDtypeStruct((PBLK_ROWS, nbt * LANE), jnp.float32),
        grid_spec=pltpu.PrefetchScalarGridSpec(
            num_scalar_prefetch=0,
            grid=(nbt,),
            in_specs=in_specs,
            out_specs=pl.BlockSpec((PBLK_ROWS, LANE), lambda i: (0, i)),
        ),
        cost_estimate=pl.CostEstimate(
            flops=2 * bp * NUM_TOPICS * HIDDEN + 6 * bp * HIDDEN,
            transcendentals=0,
            bytes_accessed=4 * (NUM_TOPICS * bp + PBLK_ROWS * PBLK_COLS
                                + PBLK_ROWS * LANE * nbt)),
        compiler_params=compiler_params,
    )(xt, p_base)

    # ---- Reduce partials & fold BN into the second Linear (once, in JAX) -----
    stats = stats.reshape(PBLK_ROWS, nbt, LANE)
    sums = jnp.sum(stats[:HIDDEN, :, 0], axis=1)               # [10]
    sqs = jnp.sum(stats[:HIDDEN, :, 1], axis=1)                # [10]
    mean = sums / B
    # Single-pass variance (E[h^2]-E[h]^2): fine for unit-scale activations,
    # but can cancel in f32 when |mean| >> std (reference uses two-pass form).
    var = jnp.maximum(sqs / B - mean * mean, 0.0)
    scale = jnp.asarray(gamma, jnp.float32).reshape(-1) * lax.rsqrt(var + BN_EPS)
    shift = jnp.asarray(beta, jnp.float32).reshape(-1) - mean * scale
    w2t = jnp.asarray(w2, jnp.float32).T                       # [4, 10]
    w2p = w2t * scale[None, :]
    b2p = jnp.asarray(b2, jnp.float32).reshape(-1) + w2t @ shift
    p_apply = p_base.at[HIDDEN:HIDDEN + OUT, 0:HIDDEN].set(w2p)
    p_apply = p_apply.at[HIDDEN:HIDDEN + OUT, HIDDEN].set(b2p)

    # ---- Pass 2: folded Linear + softmax, lane-dense [4, B_pad] output -------
    out_t = pl.pallas_call(
        _apply_kernel,
        out_shape=jax.ShapeDtypeStruct((OUT, bp), jnp.float32),
        grid_spec=pltpu.PrefetchScalarGridSpec(
            num_scalar_prefetch=0,
            grid=(nbt,),
            in_specs=in_specs,
            out_specs=pl.BlockSpec((OUT, tb), lambda i: (0, i)),
        ),
        cost_estimate=pl.CostEstimate(
            flops=2 * bp * (NUM_TOPICS * HIDDEN + HIDDEN * OUT) + 12 * bp * OUT,
            transcendentals=bp * OUT,
            bytes_accessed=4 * (NUM_TOPICS * bp + PBLK_ROWS * PBLK_COLS + OUT * bp)),
        compiler_params=compiler_params,
    )(xt, p_apply)

    return out_t.T[:B]                                          # [B, 4]


def init_params(key):
    # Deterministic synthetic init (mimics nn.Linear uniform fan-in init;
    # BatchNorm gamma=1, beta=0).
    k1, k2, k3, k4 = jax.random.split(key, 4)
    bound1 = 1.0 / jnp.sqrt(NUM_TOPICS)
    bound2 = 1.0 / jnp.sqrt(HIDDEN)
    w1 = jax.random.uniform(k1, (NUM_TOPICS, HIDDEN), jnp.float32, -bound1, bound1)
    b1 = jax.random.uniform(k2, (1, HIDDEN), jnp.float32, -bound1, bound1)
    w2 = jax.random.uniform(k3, (HIDDEN, OUT), jnp.float32, -bound2, bound2)
    b2 = jax.random.uniform(k4, (1, OUT), jnp.float32, -bound2, bound2)
    gamma = jnp.ones((1, HIDDEN), jnp.float32)
    beta = jnp.zeros((1, HIDDEN), jnp.float32)
    return w1, b1, gamma, beta, w2, b2


def reference_forward(noise, w1, b1, gamma, beta, w2, b2):
    h = noise @ w1 + b1
    h = jnp.where(h > 0, h, LEAK_FACTOR * h)
    mean = jnp.mean(h, axis=0, keepdims=True)
    var = jnp.mean((h - mean) ** 2, axis=0, keepdims=True)
    h = (h - mean) / jnp.sqrt(var + BN_EPS) * gamma + beta
    logits = h @ w2 + b2
    return jax.nn.softmax(logits, axis=1)


if __name__ == "__main__":
    key = jax.random.PRNGKey(0)
    kp, kx1, kx2 = jax.random.split(key, 3)
    w1, b1, gamma, beta, w2, b2 = init_params(kp)

    fwd_default = jax.jit(
        lambda n: alpha_generator_forward(n, w1, b1, gamma, beta, w2, b2))
    fwd_tiled = jax.jit(
        lambda n: alpha_generator_forward(n, w1, b1, gamma, beta, w2, b2,
                                          block_cols=128))

    # Small single-tile case (B=16 < one 128-lane tile -> tail masking path).
    B1 = 16
    noise1 = jax.random.normal(kx1, (B1, NUM_TOPICS), jnp.float32)
    out1 = jax.block_until_ready(fwd_default(noise1))
    ref1 = reference_forward(noise1, w1, b1, gamma, beta, w2, b2)
    assert out1.shape == (B1, OUT)
    assert jnp.allclose(out1, ref1, atol=1e-3, rtol=1e-3)
    assert jnp.allclose(jnp.sum(out1, axis=1), jnp.ones((B1,)), atol=1e-3)

    # Multi-tile + ragged-batch case exercising the cross-tile stats reduction.
    B2 = 300                      # 3 tiles of 128 lanes, tail of 44
    noise2 = jax.random.normal(kx2, (B2, NUM_TOPICS), jnp.float32)
    out2 = jax.block_until_ready(fwd_tiled(noise2))
    ref2 = reference_forward(noise2, w1, b1, gamma, beta, w2, b2)
    assert out2.shape == (B2, OUT)
    assert jnp.allclose(out2, ref2, atol=1e-3, rtol=1e-3)
    assert jnp.allclose(jnp.sum(out2, axis=1), jnp.ones((B2,)), atol=1e-3)

    print("KERNEL_OK")
</pallas_src>

<mosaic_0001>
module attributes {stable_mosaic.version = 11 : i64} {
  func.func @_stats_kernel(%arg0: i32, %arg1: memref<20x128xf32, #tpu.memory_space<vmem>>, %arg2: memref<16x128xf32, #tpu.memory_space<vmem>>, %arg3: memref<16x128xf32, #tpu.memory_space<vmem>>) attributes {dimension_semantics = [#tpu.dimension_semantics<parallel>], iteration_bounds = array<i64: 1>, scalar_prefetch = 0 : i64, scratch_operands = 0 : i64, tpu.core_type = #tpu.core_type<tc>, window_params = [{transform_indices = @transform_0, window_bounds = array<i64: 20, 128>}, {pipeline_mode = #tpu.pipeline_mode<synchronous>, transform_indices = @transform_1, window_bounds = array<i64: 16, 128>}, {transform_indices = @transform_2, window_bounds = array<i64: 16, 128>}]} {
    %c0 = arith.constant 0 : index
    %c0_0 = arith.constant 0 : index
    %0 = vector.load %arg1[%c0, %c0_0] : memref<20x128xf32, #tpu.memory_space<vmem>>, vector<20x128xf32>
    %c0_1 = arith.constant 0 : index
    %c0_2 = arith.constant 0 : index
    %1 = vector.load %arg2[%c0_1, %c0_2] : memref<16x128xf32, #tpu.memory_space<vmem>>, vector<10x20xf32>
    %c0_3 = arith.constant 0 : index
    %c20 = arith.constant 20 : index
    %2 = vector.load %arg2[%c0_3, %c20] : memref<16x128xf32, #tpu.memory_space<vmem>>, vector<10x1xf32>
    %cst = arith.constant dense<0.000000e+00> : vector<10x128xf32>
    %3 = tpu.matmul %1, %0, %cst {dimension_numbers = #tpu.dot_dimension_numbers<[1], [0], [0], [1], [0, 0, 1, 1], [], []>} : vector<10x20xf32>, vector<20x128xf32>, vector<10x128xf32> -> vector<10x128xf32>
    %4 = vector.broadcast %2 : vector<10x1xf32> to vector<10x128xf32>
    %5 = arith.addf %3, %4 : vector<10x128xf32>
    %cst_4 = arith.constant 2.000000e-01 : f32
    %6 = vector.broadcast %cst_4 : f32 to vector<10x128xf32>
    %7 = arith.mulf %6, %5 : vector<10x128xf32>
    %8 = arith.maximumf %5, %7 : vector<10x128xf32>
    %c0_i32 = arith.constant 0 : i32
    %9 = arith.cmpi eq, %arg0, %c0_i32 : i32
    %true = arith.constant true
    %10 = arith.xori %9, %true : i1
    %11 = arith.extui %10 : i1 to i32
    %c0_i32_5 = arith.constant 0 : i32
    %12 = arith.cmpi ne, %11, %c0_i32_5 : i32
    scf.if %12 {
      %cst_7 = arith.constant 0.000000e+00 : f32
      %15 = vector.broadcast %cst_7 : f32 to vector<16x128xf32>
      %c0_8 = arith.constant 0 : index
      %c0_9 = arith.constant 0 : index
      %16 = vector.load %arg3[%c0_8, %c0_9] : memref<16x128xf32, #tpu.memory_space<vmem>>, vector<16x128xf32>
      tpu.vector_store %arg3[%c0_8, %c0_9], %15 {strides = array<i32>} : memref<16x128xf32, #tpu.memory_space<vmem>>, vector<16x128xf32>,
      %cst_10 = arith.constant dense<0.000000e+00> : vector<10xf32>
      %17 = vector.multi_reduction <add>, %8, %cst_10 [1] : vector<10x128xf32> to vector<10xf32>
      %18 = vector.shape_cast %17 : vector<10xf32> to vector<10x1xf32>
      %c0_11 = arith.constant 0 : index
      %c0_12 = arith.constant 0 : index
      %19 = vector.load %arg3[%c0_11, %c0_12] : memref<16x128xf32, #tpu.memory_space<vmem>>, vector<10x1xf32>
      tpu.vector_store %arg3[%c0_11, %c0_12], %18 {strides = array<i32>} : memref<16x128xf32, #tpu.memory_space<vmem>>, vector<10x1xf32>,
      %20 = arith.mulf %8, %8 : vector<10x128xf32>
      %cst_13 = arith.constant dense<0.000000e+00> : vector<10xf32>
      %21 = vector.multi_reduction <add>, %20, %cst_13 [1] : vector<10x128xf32> to vector<10xf32>
      %22 = vector.shape_cast %21 : vector<10xf32> to vector<10x1xf32>
      %c0_14 = arith.constant 0 : index
      %c1 = arith.constant 1 : index
      %23 = vector.load %arg3[%c0_14, %c1] : memref<16x128xf32, #tpu.memory_space<vmem>>, vector<10x1xf32>
      tpu.vector_store %arg3[%c0_14, %c1], %22 {strides = array<i32>} : memref<16x128xf32, #tpu.memory_space<vmem>>, vector<10x1xf32>,
    } else {
    }
    %13 = arith.extui %9 : i1 to i32
    %c0_i32_6 = arith.constant 0 : i32
    %14 = arith.cmpi ne, %13, %c0_i32_6 : i32
    scf.if %14 {
      %15 = tpu.iota {dimensions = array<i32: 1>} : vector<10x128xi32>
      %c16_i32 = arith.constant 16 : i32
      %16 = vector.broadcast %c16_i32 : i32 to vector<10x128xi32>
      %17 = arith.cmpi slt, %15, %16 : vector<10x128xi32>
      %cst_7 = arith.constant 0.000000e+00 : f32
      %18 = vector.broadcast %cst_7 : f32 to vector<10x128xf32>
      %19 = arith.select %17, %8, %18 : vector<10x128xi1>, vector<10x128xf32>
      %cst_8 = arith.constant 0.000000e+00 : f32
      %20 = vector.broadcast %cst_8 : f32 to vector<16x128xf32>
      %c0_9 = arith.constant 0 : index
      %c0_10 = arith.constant 0 : index
      %21 = vector.load %arg3[%c0_9, %c0_10] : memref<16x128xf32, #tpu.memory_space<vmem>>, vector<16x128xf32>
      tpu.vector_store %arg3[%c0_9, %c0_10], %20 {strides = array<i32>} : memref<16x128xf32, #tpu.memory_space<vmem>>, vector<16x128xf32>,
      %cst_11 = arith.constant dense<0.000000e+00> : vector<10xf32>
      %22 = vector.multi_reduction <add>, %19, %cst_11 [1] : vector<10x128xf32> to vector<10xf32>
      %23 = vector.shape_cast %22 : vector<10xf32> to vector<10x1xf32>
      %c0_12 = arith.constant 0 : index
      %c0_13 = arith.constant 0 : index
      %24 = vector.load %arg3[%c0_12, %c0_13] : memref<16x128xf32, #tpu.memory_space<vmem>>, vector<10x1xf32>
      tpu.vector_store %arg3[%c0_12, %c0_13], %23 {strides = array<i32>} : memref<16x128xf32, #tpu.memory_space<vmem>>, vector<10x1xf32>,
      %25 = arith.mulf %19, %19 : vector<10x128xf32>
      %cst_14 = arith.constant dense<0.000000e+00> : vector<10xf32>
      %26 = vector.multi_reduction <add>, %25, %cst_14 [1] : vector<10x128xf32> to vector<10xf32>
      %27 = vector.shape_cast %26 : vector<10xf32> to vector<10x1xf32>
      %c0_15 = arith.constant 0 : index
      %c1 = arith.constant 1 : index
      %28 = vector.load %arg3[%c0_15, %c1] : memref<16x128xf32, #tpu.memory_space<vmem>>, vector<10x1xf32>
      tpu.vector_store %arg3[%c0_15, %c1], %27 {strides = array<i32>} : memref<16x128xf32, #tpu.memory_space<vmem>>, vector<10x1xf32>,
    } else {
    }
    return
  }
  func.func @transform_0(%arg0: i32) -> (i32, i32) {
    %c0_i32 = arith.constant 0 : i32
    %c0_i32_0 = arith.constant 0 : i32
    return %c0_i32, %arg0 : i32, i32
  }
  func.func @transform_1(%arg0: i32) -> (i32, i32) {
    %c0_i32 = arith.constant 0 : i32
    %c0_i32_0 = arith.constant 0 : i32
    %c0_i32_1 = arith.constant 0 : i32
    return %c0_i32, %c0_i32_0 : i32, i32
  }
  func.func @transform_2(%arg0: i32) -> (i32, i32) {
    %c0_i32 = arith.constant 0 : i32
    %c0_i32_0 = arith.constant 0 : i32
    return %c0_i32, %arg0 : i32, i32
  }
}

module attributes {stable_mosaic.version = 11 : i64} {
  func.func @_apply_kernel(%arg0: i32, %arg1: memref<20x128xf32, #tpu.memory_space<vmem>>, %arg2: memref<16x128xf32, #tpu.memory_space<vmem>>, %arg3: memref<4x128xf32, #tpu.memory_space<vmem>>) attributes {dimension_semantics = [#tpu.dimension_semantics<parallel>], iteration_bounds = array<i64: 1>, scalar_prefetch = 0 : i64, scratch_operands = 0 : i64, tpu.core_type = #tpu.core_type<tc>, window_params = [{transform_indices = @transform_0, window_bounds = array<i64: 20, 128>}, {pipeline_mode = #tpu.pipeline_mode<synchronous>, transform_indices = @transform_1, window_bounds = array<i64: 16, 128>}, {transform_indices = @transform_2, window_bounds = array<i64: 4, 128>}]} {
    %c0 = arith.constant 0 : index
    %c0_0 = arith.constant 0 : index
    %0 = vector.load %arg1[%c0, %c0_0] : memref<20x128xf32, #tpu.memory_space<vmem>>, vector<20x128xf32>
    %c0_1 = arith.constant 0 : index
    %c0_2 = arith.constant 0 : index
    %1 = vector.load %arg2[%c0_1, %c0_2] : memref<16x128xf32, #tpu.memory_space<vmem>>, vector<10x20xf32>
    %c0_3 = arith.constant 0 : index
    %c20 = arith.constant 20 : index
    %2 = vector.load %arg2[%c0_3, %c20] : memref<16x128xf32, #tpu.memory_space<vmem>>, vector<10x1xf32>
    %cst = arith.constant dense<0.000000e+00> : vector<10x128xf32>
    %3 = tpu.matmul %1, %0, %cst {dimension_numbers = #tpu.dot_dimension_numbers<[1], [0], [0], [1], [0, 0, 1, 1], [], []>} : vector<10x20xf32>, vector<20x128xf32>, vector<10x128xf32> -> vector<10x128xf32>
    %4 = vector.broadcast %2 : vector<10x1xf32> to vector<10x128xf32>
    %5 = arith.addf %3, %4 : vector<10x128xf32>
    %cst_4 = arith.constant 2.000000e-01 : f32
    %6 = vector.broadcast %cst_4 : f32 to vector<10x128xf32>
    %7 = arith.mulf %6, %5 : vector<10x128xf32>
    %8 = arith.maximumf %5, %7 : vector<10x128xf32>
    %c10 = arith.constant 10 : index
    %c0_5 = arith.constant 0 : index
    %9 = vector.load %arg2[%c10, %c0_5] : memref<16x128xf32, #tpu.memory_space<vmem>>, vector<4x10xf32>
    %c10_6 = arith.constant 10 : index
    %c10_7 = arith.constant 10 : index
    %10 = vector.load %arg2[%c10_6, %c10_7] : memref<16x128xf32, #tpu.memory_space<vmem>>, vector<4x1xf32>
    %cst_8 = arith.constant dense<0.000000e+00> : vector<4x128xf32>
    %11 = tpu.matmul %9, %8, %cst_8 {dimension_numbers = #tpu.dot_dimension_numbers<[1], [0], [0], [1], [0, 0, 1, 1], [], []>} : vector<4x10xf32>, vector<10x128xf32>, vector<4x128xf32> -> vector<4x128xf32>
    %12 = vector.broadcast %10 : vector<4x1xf32> to vector<4x128xf32>
    %13 = arith.addf %11, %12 : vector<4x128xf32>
    %cst_9 = arith.constant dense<0xFF800000> : vector<128xf32>
    %14 = vector.multi_reduction <maximumf>, %13, %cst_9 [0] : vector<4x128xf32> to vector<128xf32>
    %15 = vector.shape_cast %14 : vector<128xf32> to vector<1x128xf32>
    %16 = vector.broadcast %15 : vector<1x128xf32> to vector<4x128xf32>
    %17 = arith.subf %13, %16 : vector<4x128xf32>
    %18 = math.exp %17 : vector<4x128xf32>
    %cst_10 = arith.constant dense<0.000000e+00> : vector<128xf32>
    %19 = vector.multi_reduction <add>, %18, %cst_10 [0] : vector<4x128xf32> to vector<128xf32>
    %20 = vector.shape_cast %19 : vector<128xf32> to vector<1x128xf32>
    %21 = vector.broadcast %20 : vector<1x128xf32> to vector<4x128xf32>
    %22 = arith.divf %18, %21 : vector<4x128xf32>
    %c0_11 = arith.constant 0 : index
    %c0_12 = arith.constant 0 : index
    %23 = vector.load %arg3[%c0_11, %c0_12] : memref<4x128xf32, #tpu.memory_space<vmem>>, vector<4x128xf32>
    tpu.vector_store %arg3[%c0_11, %c0_12], %22 {strides = array<i32>} : memref<4x128xf32, #tpu.memory_space<vmem>>, vector<4x128xf32>,
    return
  }
  func.func @transform_0(%arg0: i32) -> (i32, i32) {
    %c0_i32 = arith.constant 0 : i32
    %c0_i32_0 = arith.constant 0 : i32
    return %c0_i32, %arg0 : i32, i32
  }
  func.func @transform_1(%arg0: i32) -> (i32, i32) {
    %c0_i32 = arith.constant 0 : i32
    %c0_i32_0 = arith.constant 0 : i32
    %c0_i32_1 = arith.constant 0 : i32
    return %c0_i32, %c0_i32_0 : i32, i32
  }
  func.func @transform_2(%arg0: i32) -> (i32, i32) {
    %c0_i32 = arith.constant 0 : i32
    %c0_i32_0 = arith.constant 0 : i32
    return %c0_i32, %arg0 : i32, i32
  }
}

</mosaic_0001>

<bundles_post_ra>
// kernel: _lambda_.2
= control target key start
LH: loop header
LB: loop body
LE: loop exit
PB: predicated region body
PF: predicated region fallthrough
CT: control target
= control target key end

     0   :  { %vm31_vm0 = vcmask 1043456   ;;  %v134_v0 = vmov 20   ;;  %vm26_vm1 = vcmask 162816   ;;  %v135_v6 = vmov 0.0   ;;  %s184_s1 = inlined_call_operand.vmem [shape: f32[16,128], index: 1, kind: input, shape index: {}]   ;;  %s185_s0 = inlined_call_operand.vmem [shape: f32[20,128], index: 0, kind: input, shape index: {}]   ;;  %s186_s2 = inlined_call_operand.vmem [shape: f32[16,128], index: 2, kind: output, shape index: {}]  }
   0x1   :  { %133 = vset.pattern.permute.xlu0 %v134_v0  ;;  %v15_v1 = vld [vmem:[%s184_s1 + $0x8] sm:$0x3]  ;;  %v13_v2 = vld [vmem:[%s185_s0 + $0x10] sm:$0xf]  ;;  %v11_v4 = vld [vmem:[%s185_s0] sm:$0xff]  ;;  %98 = vst [vmem:[%s186_s2] sm:$0xff] %v135_v6  ;;  %v93_v8 = vlaneseq  ;;  %vm102_vm3 = vcmask 1041408  }
   0x2   :  { %v12_v3 = vld [vmem:[%s185_s0 + $0x8] sm:$0xff]  ;;  %23 = vperm.xlu0 %133, %v15_v1   ;;  %125 = vmatpush.msk.msra.mxu0 %vm31_vm0, %v13_v2  ;;  %v14_v5 = vld [vmem:[%s184_s1] sm:$0xff]  ;;  %99 = vst [vmem:[%s186_s2 + $0x8] sm:$0xff] %v135_v6  ;;  %vm106_vm4 = vcmask 7168   ;;  %vm117_vm5 = vcmask 15368   ;;  %vm108_vm6 = vcmask 1024  }
   0x3   :  { %128 = vmatpush.msk.msra.mxu1 %vm31_vm0, %v13_v2  ;;  %v94_v11 = vand.u32 127, %v93_v8  ;;  %vm119_vm7 = vcmask 9224  }
   0x4   :  { %49 = vmatpush.msra.mxu0 %v12_v3 }
   0x5   :  { %129 = vmatpush.msra.mxu1 %v12_v3  ;;  %vm95_vm2 = vcmp.lt.s32.totalorder %v94_v11, 16 }
   0x6   :  { %50 = vmatpush.msra.mxu0 %v11_v4 }
   0x7   :  { %130 = vmatpush.msra.mxu1 %v11_v4  ;;  %126 = vmatmul.msk.f32.vlgmr.msra.gmra.mxu0 %vm26_vm1, %v14_v5 }
   0x8   :  { %127 = vmatmul.msk.f32.vlgmr.msra.gmra.mxu1 %vm26_vm1, %v15_v1 }
   0xa   :  { %18 = vperm.xlu0 %133, %v14_v5  }
  0x74   :  { %v24_v7 = vpop.permute.xlu0 %23 }
  0x7c   :  { %v19_v9 = vpop.permute.xlu0 %18 }
  0x84   :  { %v52_v10 = vpop.f32.mrf.mxu0 }
  0x85   :  { %v53_v12 = vadd.f32 %v52_v10, %v19_v9  ;;  %v55_v13 = vpop.f32.mrf.mxu1 }
  0x86   :  { %v56_v14 = vadd.f32 %v55_v13, %v24_v7 }
  0x87   :  { %v58_v15 = vmul.f32 0.2, %v53_v12 }
  0x88   :  { %v59_v16 = vmul.f32 0.2, %v56_v14 }
  0x89   :  { %v60_v17 = vmax.f32 %v53_v12, %v58_v15 }
  0x8a   :  { %v61_v18 = vmax.f32 %v56_v14, %v59_v16 }
  0x8b   :  { %v96_v19 = vsel %vm95_vm2, %v60_v17, 0.0 }
  0x8c   :  { %100 = vadd.xlane.f32.xlu1 %v96_v19  ;;  %v110_v20 = vmul.f32 %v96_v19, %v96_v19  ;;  %v97_v21 = vsel %vm95_vm2, %v61_v18, 0.0 }
  0x8d   :  { %v111_v22 = vmul.f32 %v97_v21, %v97_v21  ;;  %v103_v23 = vsel %vm102_vm3, %v97_v21, 0.0 }
  0x8e   :  { %112 = vadd.xlane.f32.xlu2 %v110_v20 }
  0x8f   :  { %v114_v24 = vsel %vm102_vm3, %v111_v22, 0.0 }
  0x94   :  { %104 = vadd.xlane.f32.xlu1 %v103_v23 }
  0x96   :  { %115 = vadd.xlane.f32.xlu2 %v114_v24 }
  0xff   :  { %v101_v25 = vpop.xlane.xlu1 %100 }
 0x100   :  { %107 = vst.msk [vmem:[%s186_s2] sm:$0xff] %vm106_vm4, %v101_v25 }
 0x101   :  { %v113_v26 = vpop.xlane.xlu2 %112 }
 0x102   :  { %118 = vst.msk [vmem:[%s186_s2] sm:$0xff] %vm117_vm5, %v113_v26 }
 0x107   :  { %v105_v27 = vpop.xlane.xlu1 %104 }
 0x108   :  { %109 = vst.msk [vmem:[%s186_s2 + $0x8] sm:$0x3] %vm108_vm6, %v105_v27 }
 0x109   :  { %v116_v28 = vpop.xlane.xlu2 %115 }
 0x10a   :  { %120 = vst.msk [vmem:[%s186_s2 + $0x8] sm:$0x3] %vm119_vm7, %v116_v28 }

// kernel: _lambda_.3
= control target key start
LH: loop header
LB: loop body
LE: loop exit
PB: predicated region body
PF: predicated region fallthrough
CT: control target
= control target key end

     0   :  { %vm32_vm0 = vcmask 1043456   ;;  %s232_s0 = inlined_call_operand.vmem [shape: f32[20,128], index: 0, kind: input, shape index: {}]   ;;  %s233_s1 = inlined_call_operand.vmem [shape: f32[16,128], index: 1, kind: input, shape index: {}]   ;;  %s234_s2 = inlined_call_operand.hbm [shape: f32[4,128], index: 2, kind: output, shape index: {}]  }
   0x1   :  { %v14_v0 = vld [vmem:[%s232_s0 + $0x10] sm:$0xf]  ;;  %v13_v1 = vld [vmem:[%s232_s0 + $0x8] sm:$0xff] }
   0x2   :  { %145 = vmatpush.msk.msra.mxu0 %vm32_vm0, %v14_v0  ;;  %150 = vmatpush.msk.msra.mxu2 %vm32_vm0, %v14_v0 }
   0x3   :  { %7 = vsyncpa [#allocation3], 0  ;;  %v12_v2 = vld [vmem:[%s232_s0] sm:$0xff]  ;;  %v189_v3 = vmov 20   ;;  %vm27_vm1 = vcmask 162816   ;;  %v190_v7 = vmov 10  }
   0x4   :  { %156 = vset.pattern.permute.xlu0 %v189_v3  ;;  %50 = vmatpush.msra.mxu0 %v13_v1  ;;  %v15_v4 = vld [vmem:[%s233_s1] sm:$0xff]  ;;  %v16_v5 = vld [vmem:[%s233_s1 + $0x8] sm:$0x3]  ;;  %v63_v6 = vld [vmem:[%s233_s1 + $0xa] sm:$0xf]  ;;  %vm72_vm2 = vcmask 1041408  }
   0x5   :  { %151 = vmatpush.msra.mxu2 %v13_v1  ;;  %24 = vperm.xlu0 %156, %v16_v5   ;;  %vm69_vm3 = vcmask 80896   ;;  %s191_s1 = smov [#allocation2]   ;;  %s136_s23 = sshll.u32 %s234_s2, 4  ;;  %s137_s23 = int_to_ptr.hbm [resolvable:$true] %s136_s23 }
   0x6   :  { %51 = vmatpush.msra.mxu0 %v12_v2  ;;  %157 = vset.pattern.permute.xlu1 %v190_v7  ;;  %s134_s20 = sshll.u32 %s191_s1, 4  ;;  %s135_s20 = int_to_ptr.vmem [resolvable:$true] %s134_s20 }
   0x7   :  { %152 = vmatpush.msra.mxu2 %v12_v2  ;;  %146 = vmatmul.msk.f32.vlgmr.msra.gmra.mxu0 %vm27_vm1, %v15_v4 }
   0x8   :  { %147 = vmatmul.msk.f32.vlgmr.msra.gmra.mxu2 %vm27_vm1, %v16_v5  ;;  %66 = vperm.xlu1 %157, %v63_v6  }
   0xd   :  { %19 = vperm.xlu0 %156, %v15_v4  }
  0x15   :  { %158 = vset.pattern.permute.xlu0 %v190_v7 }
  0x77   :  { %v25_v8 = vpop.permute.xlu0 %24 }
  0x7a   :  { %v67_v18 = vpop.permute.xlu1 %66 }
  0x7f   :  { %v20_v9 = vpop.permute.xlu0 %19 }
  0x84   :  { %v53_v10 = vpop.f32.mrf.mxu0 }
  0x85   :  { %v54_v11 = vadd.f32 %v53_v10, %v20_v9 }
  0x87   :  { %v59_v14 = vmul.f32 0.2, %v54_v11 }
  0x89   :  { %v61_v17 = vmax.f32 %v54_v11, %v59_v14 }
  0x8b   :  { %v56_v12 = vpop.f32.mrf.mxu2 }
  0x8c   :  { %v57_v13 = vadd.f32 %v56_v12, %v25_v8 }
  0x8e   :  { %v60_v15 = vmul.f32 0.2, %v57_v13 }
  0x90   :  { %v62_v16 = vmax.f32 %v57_v13, %v60_v15 }
  0x92   :  { %148 = vmatpush.msk.msra.mxu1 %vm72_vm2, %v62_v16 }
  0x94   :  { %91 = vmatpush.msra.mxu1 %v61_v17 }
  0x95   :  { %149 = vmatmul.msk.f32.vlgmr.msra.gmra.mxu1 %vm69_vm3, %v63_v6 }
 0x112   :  { %v93_v19 = vpop.f32.mrf.mxu1 }
 0x113   :  { %v94_v20 = vadd.f32 %v93_v19, %v67_v18 }
 0x115   :  { %v96_v21 = vsel %vm32_vm0, %v94_v20, -inf }
 0x116   :  { %v97_v22 = vrot.slane %v96_v21, 4 }
 0x118   :  { %v98_v23 = vmax.f32 %v96_v21, %v97_v22 }
 0x11a   :  { %v99_v24 = vrot.slane %v98_v23, 2 }
 0x11c   :  { %v100_v25 = vmax.f32 %v98_v23, %v99_v24 }
 0x11e   :  { %v101_v26 = vrot.slane %v100_v25, 1 }
 0x120   :  { %v102_v27 = vmax.f32 %v100_v25, %v101_v26 }
 0x122   :  { %v103_v28 = vsub.f32 %v94_v20, %v102_v27 }
 0x124   :  { %v104_v29 = vmul.f32 1.442695, %v103_v28 }
 0x126   :  { %159 = vpow2.f32 %v104_v29 }
 0x12c   :  { %v160_v30 = vpop.eup %159 }
 0x12d   :  { %v106_v31 = vsel %vm32_vm0, %v160_v30, 0.0 }
 0x12e   :  { %v107_v32 = vrot.slane %v106_v31, 4 }
 0x130   :  { %v108_v33 = vadd.f32 %v107_v32, %v106_v31 }
 0x132   :  { %v109_v34 = vrot.slane %v108_v33, 2 }
 0x134   :  { %v110_v35 = vadd.f32 %v109_v34, %v108_v33 }
 0x136   :  { %v111_v36 = vrot.slane %v110_v35, 1 }
 0x138   :  { %v112_v37 = vadd.f32 %v111_v36, %v110_v35 }
 0x13a   :  { %161 = vrcp.f32 %v112_v37  ;;  %v124_v41 = vand.u32 2147483648, %v112_v37  ;;  %v122_v43 = vand.u32 2147483647, %v112_v37  ;;  %vm118_vm5 = vweird.f32 %v112_v37 }
 0x13c   :  { %v125_v45 = vor.u32 1.1754944e-38, %v124_v41  ;;  %vm123_vm7 = vcmp.eq.f32.partialorder %v122_v43, 8.507059e+37 }
 0x140   :  { %v162_v38 = vpop.eup %161 }
 0x141   :  { %v114_v39 = vmul.f32 %v162_v38, %v112_v37  ;;  %vm119_vm4 = vweird.f32 %v162_v38 }
 0x142   :  { %vm120_vm6 = vmor %vm118_vm5, %vm119_vm4 }
 0x143   :  { %v115_v40 = vsub.f32 1.0, %v114_v39 }
 0x145   :  { %v116_v42 = vmul.f32 %v162_v38, %v115_v40 }
 0x147   :  { %v117_v44 = vadd.f32 %v162_v38, %v116_v42 }
 0x149   :  { %v121_v46 = vsel %vm120_vm6, %v162_v38, %v117_v44 }
 0x14a   :  { %v126_v47 = vsel %vm123_vm7, %v125_v45, %v121_v46 }
 0x14b   :  { %v127_v48 = vmul.f32 %v160_v30, %v126_v47 }
 0x14d   :  { %128 = vst [vmem:[#allocation2] sm:$0xf] %v127_v48 }
 0x14e   :  { %139 = dma.vmem_to_hbm [thread:$0]  %s135_s20, 64, %s137_s23, [#allocation3]  }
 0x14f   :  { %187 = dma.done.wait [#allocation3], 64  }
 0x150   :  { %188 = vsyncadd [#allocation3], 4294967232 }
 0x151   :  { %144 = vsyncpa [#allocation3], 1 }

</bundles_post_ra>
